<compile_context>
chip_gen: v7x
topology: tpu7x:2x2x1
jax: 0.10.0
libtpu: 0.0.40
codegen_flags: <defaults>
</compile_context>

<pallas_src>
import jax
import jax.numpy as jnp
from jax.experimental import pallas as pl
from jax.experimental.pallas import tpu as pltpu


def _cdiv(a, b):
    return (a + b - 1) // b


def _round_up(x, m):
    return _cdiv(x, m) * m


def _pick_tm(batch, vmem_bytes_per_row, tm_cap=8192):
    """Batch-tile (rows per grid step).

    Large enough that per-step DMA amortizes the ~0.35 us grid-step overhead,
    small enough to keep the per-step working set within a ~12 MiB budget,
    >= 2 blocks when the batch allows (v7x has 2 TensorCores sharding the
    "parallel" grid axis), and derived from ceil(B / nblk) so padding waste is
    bounded by the rounding granularity instead of ~50% of the batch.
    """
    budget = 12 << 20
    tm_max = max(256, min(tm_cap, budget // max(1, vmem_bytes_per_row)))
    if batch <= 256:
        return _round_up(batch, 16)            # single small block
    gran = 128 if batch >= 1024 else 16        # lane-dense output stores when it matters
    nblk = max(2, _cdiv(batch, tm_max))        # >= 2 so both v7x TCs get work
    return min(_round_up(_cdiv(batch, nblk), gran), _round_up(tm_max, gran))


def _vmem_limit(step_bytes):
    # Only ever *raises* the default scoped limit (v5e default is 16 MiB) and
    # never asks for more than v7x's 64 MiB physical VMEM.
    return int(min(64 << 20, max(32 << 20, 2 * step_bytes)))


# ---------------------------------------------------------------------------
# Kernels
# ---------------------------------------------------------------------------

def shallom_slab_kernel(head_ref, rel_ref, tail_ref,
                        w1h_ref, w1r_ref, w1t_ref, b1_ref,
                        w2_ref, b2_ref, o_ref):
    """sigmoid( ReLU( [head|rel|tail] @ W1' + b1' ) @ w2 + b2 ) on pre-gathered slabs."""
    # Linear(3D -> W3) with BN folded in; bf16 operands, f32 accumulation (MXU).
    h = jnp.dot(head_ref[...], w1h_ref[...], preferred_element_type=jnp.float32)
    h = h + jnp.dot(rel_ref[...], w1r_ref[...], preferred_element_type=jnp.float32)
    h = h + jnp.dot(tail_ref[...], w1t_ref[...], preferred_element_type=jnp.float32)
    h = h + b1_ref[...]                 # (TM, W3) f32
    h = jnp.maximum(h, 0.0)             # ReLU (Dropouts are identity in eval)

    # Linear(W3 -> 1), produced lane-dense: (1, W3) x (TM, W3)^T -> (1, TM)
    # (avoids a masked (TM, 1) store / sublane->lane relayout).
    y = jax.lax.dot_general(w2_ref[...], h, (((1,), (1,)), ((), ())),
                            preferred_element_type=jnp.float32)
    y = y + b2_ref[0, 0]                # scalar bias from SMEM
    o_ref[...] = jax.nn.sigmoid(y).reshape(o_ref.shape)   # (1, 1, TM) block


def shallom_fused_gather_kernel(idx_ref, a_ref, b1_ref, w2_ref, b2_ref, o_ref):
    """Fused gather + MLP for VMEM-resident tables.

    a_ref is the pre-projected stacked table [Ent@W1h ; Rel@W1r ; Ent@W1t]
    (rows pre-offset in the indices).  A 'three-hot' selector matmul gathers
    AND sums the head/rel/tail contributions in one MXU pass, so the first
    Linear never touches HBM activations at all.
    """
    tm = idx_ref.shape[0]
    nt = a_ref.shape[0]
    idx = idx_ref[...]                                           # (TM, 3) int32
    iota = jax.lax.broadcasted_iota(jnp.int32, (tm, nt), 1)
    hot = ((iota == idx[:, 0:1]) |
           (iota == idx[:, 1:2]) |
           (iota == idx[:, 2:3]))                                # (TM, NT) bool
    hot = jnp.where(hot, 1.0, 0.0).astype(a_ref.dtype)           # exact {0,1} selector
    h = jnp.dot(hot, a_ref[...], preferred_element_type=jnp.float32)  # (TM, W3) f32
    h = h + b1_ref[...]
    h = jnp.maximum(h, 0.0)             # ReLU (Dropouts are identity in eval)

    y = jax.lax.dot_general(w2_ref[...], h, (((1,), (1,)), ((), ())),
                            preferred_element_type=jnp.float32)  # (1, TM)
    y = y + b2_ref[0, 0]
    o_ref[...] = jax.nn.sigmoid(y).reshape(o_ref.shape)


# ---------------------------------------------------------------------------
# pallas_call wrappers
# ---------------------------------------------------------------------------

def shallom_slab_pallas(head, rel, tail, w1h, w1r, w1t, b1, w2, b2, *, tm):
    b_pad, d = head.shape
    w3 = w1h.shape[1]
    assert b_pad % tm == 0
    nblk = b_pad // tm

    act_spec = pl.BlockSpec((tm, d), lambda i: (i, 0))      # batch-tiled activations
    # Constant index_map -> weights stay VMEM-resident across grid steps.
    # TODO(synk): for very large D on v7x, pipeline_mode=pl.Buffered(1) here would
    # halve the (already tiny at D=32) weight footprint.
    w1_spec = pl.BlockSpec((d, w3), lambda i: (0, 0))
    vec_spec = pl.BlockSpec((1, w3), lambda i: (0, 0))

    step_bytes = (2 * 3 * tm * d * 2 + 2 * 3 * d * w3 * 2
                  + 3 * tm * w3 * 4 + 2 * tm * 4)
    cost = pl.CostEstimate(
        flops=2 * b_pad * (3 * d) * w3 + 2 * b_pad * w3,
        transcendentals=b_pad,
        bytes_accessed=3 * b_pad * d * 2 + 3 * d * w3 * 2 + 2 * w3 * 4 + b_pad * 4)

    return pl.pallas_call(
        shallom_slab_kernel,
        out_shape=jax.ShapeDtypeStruct((nblk, 1, tm), jnp.float32),
        grid=(nblk,),
        in_specs=[act_spec, act_spec, act_spec,
                  w1_spec, w1_spec, w1_spec,
                  vec_spec, vec_spec,
                  pl.BlockSpec(memory_space=pltpu.MemorySpace.SMEM)],
        out_specs=pl.BlockSpec((1, 1, tm), lambda i: (i, 0, 0)),
        compiler_params=pltpu.CompilerParams(
            dimension_semantics=("parallel",),
            vmem_limit_bytes=_vmem_limit(step_bytes)),
        cost_estimate=cost,
    )(head, rel, tail, w1h, w1r, w1t, b1, w2, b2)


def shallom_fused_gather_pallas(idx, a_table, b1, w2, b2, *, tm):
    b_pad = idx.shape[0]
    nt, w3 = a_table.shape
    assert b_pad % tm == 0
    nblk = b_pad // tm

    idx_spec = pl.BlockSpec((tm, 3), lambda i: (i, 0))       # per-block int32 indices
    tab_spec = pl.BlockSpec((nt, w3), lambda i: (0, 0))      # whole table, VMEM-resident
    vec_spec = pl.BlockSpec((1, w3), lambda i: (0, 0))

    step_bytes = (2 * tm * 3 * 4 + 2 * nt * w3 * 2 + tm * nt * 2
                  + 2 * tm * w3 * 4 + 2 * tm * 4)
    cost = pl.CostEstimate(
        flops=2 * b_pad * nt * w3 + 2 * b_pad * w3,
        transcendentals=b_pad,
        bytes_accessed=b_pad * 3 * 4 + nt * w3 * 2 + 2 * w3 * 4 + b_pad * 4)

    return pl.pallas_call(
        shallom_fused_gather_kernel,
        out_shape=jax.ShapeDtypeStruct((nblk, 1, tm), jnp.float32),
        grid=(nblk,),
        in_specs=[idx_spec, tab_spec, vec_spec, vec_spec,
                  pl.BlockSpec(memory_space=pltpu.MemorySpace.SMEM)],
        out_specs=pl.BlockSpec((1, 1, tm), lambda i: (i, 0, 0)),
        compiler_params=pltpu.CompilerParams(
            dimension_semantics=("parallel",),
            vmem_limit_bytes=_vmem_limit(step_bytes)),
        cost_estimate=cost,
    )(idx, a_table, b1, w2, b2)


# ---------------------------------------------------------------------------
# Model wrapper
# ---------------------------------------------------------------------------

class BaselineEmbeddingsOnlyModelPallas:
    """JAX/Pallas port of BaselineEmdeddingsOnlyModel (inference)."""

    EPS = 1e-5                   # BatchNorm1d default eps
    FUSE_MAX_TABLE_ROWS = 1024   # fuse the gather when 2*Ne+Nr <= this: rough
                                 # break-even of the in-kernel MXU gather vs the
                                 # HBM slab round-trip, and keeps the (TM, NT)
                                 # selector comfortably inside VMEM.

    def __init__(self, embedding_dim, num_entities, num_relations, key,
                 compute_dtype=jnp.bfloat16):
        self.embedding_dim = embedding_dim
        self.num_entities = num_entities
        self.num_relations = num_relations
        # shallom_width / shallom_width2 are computed but unused by the original
        # module's Sequential; only width3 matters.
        self.shallom_width3 = int(1 * embedding_dim)

        D = embedding_dim
        W3 = self.shallom_width3
        k = jax.random.split(key, 6)

        # Frozen "pretrained" embeddings (synthetic stand-in for dataset.emb_*),
        # stored bf16: halves the dominant HBM stream of the un-fused path.
        self.entity_embeddings = jax.random.normal(
            k[0], (num_entities, D), jnp.float32).astype(compute_dtype)
        self.relation_embeddings = jax.random.normal(
            k[1], (num_relations, D), jnp.float32).astype(compute_dtype)

        # Linear(3D -> W3)  (stored transposed: (in, out)).
        bound1 = 1.0 / jnp.sqrt(3.0 * D)
        w1 = jax.random.uniform(k[2], (3 * D, W3), jnp.float32, -bound1, bound1)
        b1 = jax.random.uniform(k[3], (W3,), jnp.float32, -bound1, bound1)

        # BatchNorm1d(W3) params / running stats (PyTorch defaults, eval mode),
        # folded into the first Linear.
        gamma = jnp.ones((W3,), jnp.float32)
        beta = jnp.zeros((W3,), jnp.float32)
        running_mean = jnp.zeros((W3,), jnp.float32)
        running_var = jnp.ones((W3,), jnp.float32)
        scale = gamma * jax.lax.rsqrt(running_var + self.EPS)
        w1_f = w1 * scale[None, :]
        b1_f = (b1 - running_mean) * scale + beta

        # Split W1' into the three concat segments (torch.cat never materialized).
        self.w1_head = w1_f[0 * D:1 * D].astype(compute_dtype)
        self.w1_rel = w1_f[1 * D:2 * D].astype(compute_dtype)
        self.w1_tail = w1_f[2 * D:3 * D].astype(compute_dtype)
        self.b1 = b1_f.reshape(1, W3)

        # Linear(W3 -> 1)  (tiny; kept f32, feeds the lane-dense projection).
        bound2 = 1.0 / jnp.sqrt(float(W3))
        self.w2 = jax.random.uniform(k[4], (1, W3), jnp.float32, -bound2, bound2)
        self.b2 = jax.random.uniform(k[5], (1, 1), jnp.float32, -bound2, bound2)

        # Fused-gather path: pre-project the frozen tables through the BN-folded
        # first Linear (one-time init cost, exact reassociation of the eval-mode
        # forward) and stack them so one in-kernel "three-hot" matmul gathers and
        # sums head/rel/tail contributions at once.
        n_total = 2 * num_entities + num_relations
        self.fuse_gather = n_total <= self.FUSE_MAX_TABLE_ROWS
        if self.fuse_gather:
            ent32 = self.entity_embeddings.astype(jnp.float32)
            rel32 = self.relation_embeddings.astype(jnp.float32)
            a_head = ent32 @ w1_f[0 * D:1 * D]
            a_rel = rel32 @ w1_f[1 * D:2 * D]
            a_tail = ent32 @ w1_f[2 * D:3 * D]
            self.a_table = jnp.concatenate(
                [a_head, a_rel, a_tail], axis=0).astype(compute_dtype)
            self.rel_row_offset = num_entities
            self.tail_row_offset = num_entities + num_relations

    def __call__(self, e1_idx, rel_idx, e2_idx, fuse_gather=None):
        fuse = self.fuse_gather if fuse_gather is None else (fuse_gather and self.fuse_gather)
        B = e1_idx.shape[0]
        D = self.embedding_dim
        W3 = self.shallom_width3

        if fuse:
            nt = self.a_table.shape[0]
            bytes_per_row = 2 * nt + 8 * W3 + 56      # (TM, NT) selector dominates
        else:
            bytes_per_row = 12 * D + 12 * W3 + 8      # bf16 slabs + f32 intermediates
        tm = _pick_tm(B, bytes_per_row, tm_cap=8192)

        b_pad = _round_up(B, tm)
        if b_pad != B:
            zpad = jnp.zeros((b_pad - B,), e1_idx.dtype)   # index 0 -> discarded rows
            e1_idx = jnp.concatenate([e1_idx, zpad])
            rel_idx = jnp.concatenate([rel_idx, zpad])
            e2_idx = jnp.concatenate([e2_idx, zpad])

        if fuse:
            idx = jnp.stack(
                [e1_idx,
                 rel_idx + self.rel_row_offset,
                 e2_idx + self.tail_row_offset], axis=1).astype(jnp.int32)
            out = shallom_fused_gather_pallas(
                idx, self.a_table, self.b1, self.w2, self.b2, tm=tm)
        else:
            # TODO(synk): for entity tables too large for VMEM the gather stays in
            # XLA: Mosaic exposes no vectorized gather from a VMEM table of
            # arbitrary row count, and a per-row DMA gather (64 B at D=32) is
            # slower than this slab round-trip.
            head = jnp.take(self.entity_embeddings, e1_idx, axis=0)
            relv = jnp.take(self.relation_embeddings, rel_idx, axis=0)
            tail = jnp.take(self.entity_embeddings, e2_idx, axis=0)
            out = shallom_slab_pallas(head, relv, tail,
                                      self.w1_head, self.w1_rel, self.w1_tail,
                                      self.b1, self.w2, self.b2, tm=tm)
        # (nblk, 1, TM) lane-dense slab  ->  (B, 1)
        return out.reshape(-1)[:B].reshape(B, 1)


if __name__ == "__main__":
    key = jax.random.PRNGKey(0)
    k_model, k_e1, k_rel, k_e2 = jax.random.split(key, 4)

    embedding_dim = 32
    num_entities = 50
    num_relations = 10
    batch = 8

    model = BaselineEmbeddingsOnlyModelPallas(
        embedding_dim, num_entities, num_relations, k_model)

    e1_idx = jax.random.randint(k_e1, (batch,), 0, num_entities)
    rel_idx = jax.random.randint(k_rel, (batch,), 0, num_relations)
    e2_idx = jax.random.randint(k_e2, (batch,), 0, num_entities)

    # Fused in-kernel-gather path (tables fit VMEM at these sizes).
    out = jax.block_until_ready(model(e1_idx, rel_idx, e2_idx))
    # Pre-gathered slab path (what large entity tables fall back to).
    out_slab = jax.block_until_ready(model(e1_idx, rel_idx, e2_idx, fuse_gather=False))

    for o in (out, out_slab):
        assert o.shape == (batch, 1), o.shape
        assert bool(jnp.all(jnp.isfinite(o)))
        assert bool(jnp.all((o >= 0.0) & (o <= 1.0)))

    # Pure-JAX f32 reference (explicit concat, same folded weights).
    ent_f32 = model.entity_embeddings.astype(jnp.float32)
    rel_f32 = model.relation_embeddings.astype(jnp.float32)
    x_ref = jnp.concatenate(
        [ent_f32[e1_idx], rel_f32[rel_idx], ent_f32[e2_idx]], axis=1)
    w1_ref = jnp.concatenate(
        [model.w1_head, model.w1_rel, model.w1_tail], axis=0).astype(jnp.float32)
    h_ref = jnp.maximum(x_ref @ w1_ref + model.b1, 0.0)
    ref = jax.nn.sigmoid(h_ref @ model.w2.T + model.b2[0, 0])
    assert float(jnp.max(jnp.abs(out - ref))) < 5e-2
    assert float(jnp.max(jnp.abs(out_slab - ref))) < 5e-2
    assert float(jnp.max(jnp.abs(out - out_slab))) < 5e-2

    print("KERNEL_OK")
</pallas_src>

<mosaic_0001>
module attributes {stable_mosaic.version = 11 : i64} {
  func.func @shallom_fused_gather_kernel(%arg0: i32, %arg1: memref<16x3xi32, #tpu.memory_space<vmem>>, %arg2: memref<110x32xbf16, #tpu.memory_space<vmem>>, %arg3: memref<1x32xf32, #tpu.memory_space<vmem>>, %arg4: memref<1x32xf32, #tpu.memory_space<vmem>>, %arg5: memref<1x1xf32, #tpu.memory_space<smem>>, %arg6: memref<1x1x16xf32, #tpu.memory_space<vmem>>) attributes {dimension_semantics = [#tpu.dimension_semantics<parallel>], iteration_bounds = array<i64: 1>, scalar_prefetch = 0 : i64, scratch_operands = 0 : i64, tpu.core_type = #tpu.core_type<tc>, window_params = [{transform_indices = @transform_0, window_bounds = array<i64: 16, 3>}, {pipeline_mode = #tpu.pipeline_mode<synchronous>, transform_indices = @transform_1, window_bounds = array<i64: 110, 32>}, {pipeline_mode = #tpu.pipeline_mode<synchronous>, transform_indices = @transform_2, window_bounds = array<i64: 1, 32>}, {pipeline_mode = #tpu.pipeline_mode<synchronous>, transform_indices = @transform_3, window_bounds = array<i64: 1, 32>}, {transform_indices = @transform_4, window_bounds = array<i64: 1, 1>}, {transform_indices = @transform_5, window_bounds = array<i64: 1, 1, 16>}]} {
    %c0 = arith.constant 0 : index
    %c0_0 = arith.constant 0 : index
    %0 = vector.load %arg1[%c0, %c0_0] : memref<16x3xi32, #tpu.memory_space<vmem>>, vector<16x3xi32>
    %1 = tpu.iota {dimensions = array<i32: 1>} : vector<16x110xi32>
    %2 = vector.extract_strided_slice %0 {offsets = [0, 0], sizes = [16, 1], strides = [1, 1]} : vector<16x3xi32> to vector<16x1xi32>
    %3 = vector.broadcast %2 : vector<16x1xi32> to vector<16x110xi32>
    %4 = arith.cmpi eq, %1, %3 : vector<16x110xi32>
    %5 = vector.extract_strided_slice %0 {offsets = [0, 1], sizes = [16, 1], strides = [1, 1]} : vector<16x3xi32> to vector<16x1xi32>
    %6 = vector.broadcast %5 : vector<16x1xi32> to vector<16x110xi32>
    %7 = arith.cmpi eq, %1, %6 : vector<16x110xi32>
    %8 = arith.ori %4, %7 : vector<16x110xi1>
    %9 = vector.extract_strided_slice %0 {offsets = [0, 2], sizes = [16, 1], strides = [1, 1]} : vector<16x3xi32> to vector<16x1xi32>
    %10 = vector.broadcast %9 : vector<16x1xi32> to vector<16x110xi32>
    %11 = arith.cmpi eq, %1, %10 : vector<16x110xi32>
    %12 = arith.ori %8, %11 : vector<16x110xi1>
    %cst = arith.constant 1.000000e+00 : f32
    %cst_1 = arith.constant 0.000000e+00 : f32
    %13 = vector.broadcast %cst : f32 to vector<16x110xf32>
    %14 = vector.broadcast %cst_1 : f32 to vector<16x110xf32>
    %15 = arith.select %12, %13, %14 : vector<16x110xi1>, vector<16x110xf32>
    %16 = arith.truncf %15 : vector<16x110xf32> to vector<16x110xbf16>
    %c0_2 = arith.constant 0 : index
    %c0_3 = arith.constant 0 : index
    %17 = vector.load %arg2[%c0_2, %c0_3] : memref<110x32xbf16, #tpu.memory_space<vmem>>, vector<110x32xbf16>
    %cst_4 = arith.constant dense<0.000000e+00> : vector<16x32xf32>
    %18 = tpu.matmul %16, %17, %cst_4 {dimension_numbers = #tpu.dot_dimension_numbers<[1], [0], [0], [1], [0, 0, 1, 1], [], []>} : vector<16x110xbf16>, vector<110x32xbf16>, vector<16x32xf32> -> vector<16x32xf32>
    %c0_5 = arith.constant 0 : index
    %c0_6 = arith.constant 0 : index
    %19 = vector.load %arg3[%c0_5, %c0_6] : memref<1x32xf32, #tpu.memory_space<vmem>>, vector<1x32xf32>
    %20 = vector.broadcast %19 : vector<1x32xf32> to vector<16x32xf32>
    %21 = arith.addf %18, %20 : vector<16x32xf32>
    %cst_7 = arith.constant 0.000000e+00 : f32
    %22 = vector.broadcast %cst_7 : f32 to vector<16x32xf32>
    %23 = arith.maximumf %21, %22 : vector<16x32xf32>
    %c0_8 = arith.constant 0 : index
    %c0_9 = arith.constant 0 : index
    %24 = vector.load %arg4[%c0_8, %c0_9] : memref<1x32xf32, #tpu.memory_space<vmem>>, vector<1x32xf32>
    %cst_10 = arith.constant dense<0.000000e+00> : vector<1x16xf32>
    %25 = tpu.matmul %24, %23, %cst_10 {dimension_numbers = #tpu.dot_dimension_numbers<[1], [1], [0], [0], [0, 0, 1, 0], [], []>} : vector<1x32xf32>, vector<16x32xf32>, vector<1x16xf32> -> vector<1x16xf32>
    %c0_11 = arith.constant 0 : index
    %c0_12 = arith.constant 0 : index
    %26 = memref.load %arg5[%c0_11, %c0_12] : memref<1x1xf32, #tpu.memory_space<smem>>
    %27 = vector.broadcast %26 : f32 to vector<1x16xf32>
    %28 = arith.addf %25, %27 : vector<1x16xf32>
    %29 = arith.negf %28 : vector<1x16xf32>
    %30 = math.exp %29 : vector<1x16xf32>
    %cst_13 = arith.constant 1.000000e+00 : f32
    %31 = vector.broadcast %cst_13 : f32 to vector<1x16xf32>
    %32 = arith.addf %31, %30 : vector<1x16xf32>
    %33 = arith.divf %31, %32 : vector<1x16xf32>
    %34 = vector.shape_cast %33 : vector<1x16xf32> to vector<1x1x16xf32>
    %c0_14 = arith.constant 0 : index
    %c0_15 = arith.constant 0 : index
    %c0_16 = arith.constant 0 : index
    %35 = vector.load %arg6[%c0_14, %c0_15, %c0_16] : memref<1x1x16xf32, #tpu.memory_space<vmem>>, vector<1x1x16xf32>
    tpu.vector_store %arg6[%c0_14, %c0_15, %c0_16], %34 {strides = array<i32>} : memref<1x1x16xf32, #tpu.memory_space<vmem>>, vector<1x1x16xf32>,
    return
  }
  func.func @transform_0(%arg0: i32) -> (i32, i32) {
    %c0_i32 = arith.constant 0 : i32
    %c0_i32_0 = arith.constant 0 : i32
    return %arg0, %c0_i32 : i32, i32
  }
  func.func @transform_1(%arg0: i32) -> (i32, i32) {
    %c0_i32 = arith.constant 0 : i32
    %c0_i32_0 = arith.constant 0 : i32
    %c0_i32_1 = arith.constant 0 : i32
    return %c0_i32, %c0_i32_0 : i32, i32
  }
  func.func @transform_2(%arg0: i32) -> (i32, i32) {
    %c0_i32 = arith.constant 0 : i32
    %c0_i32_0 = arith.constant 0 : i32
    %c0_i32_1 = arith.constant 0 : i32
    return %c0_i32, %c0_i32_0 : i32, i32
  }
  func.func @transform_3(%arg0: i32) -> (i32, i32) {
    %c0_i32 = arith.constant 0 : i32
    %c0_i32_0 = arith.constant 0 : i32
    %c0_i32_1 = arith.constant 0 : i32
    return %c0_i32, %c0_i32_0 : i32, i32
  }
  func.func @transform_4(%arg0: i32) -> (i32, i32) {
    %c0_i32 = arith.constant 0 : i32
    %c0_i32_0 = arith.constant 0 : i32
    %c0_i32_1 = arith.constant 0 : i32
    return %c0_i32, %c0_i32_0 : i32, i32
  }
  func.func @transform_5(%arg0: i32) -> (i32, i32, i32) {
    %c0_i32 = arith.constant 0 : i32
    %c0_i32_0 = arith.constant 0 : i32
    %c0_i32_1 = arith.constant 0 : i32
    return %arg0, %c0_i32, %c0_i32_0 : i32, i32, i32
  }
}

</mosaic_0001>

<bundles_post_ra>
// kernel: tpu_custom_call.1
= control target key start
LH: loop header
LB: loop body
LE: loop exit
PB: predicated region body
PF: predicated region fallthrough
CT: control target
= control target key end

     0   :  { %v375_v1 = vmov 1   ;;  %v376_v2 = vmov 0   ;;  %v377_v5 = vmov 0.0   ;;  %s460_s0 = inlined_call_operand.vmem [shape: s32[16,3], index: 0, kind: input, shape index: {}]   ;;  %s461_s1 = inlined_call_operand.vmem [shape: bf16[110,32], index: 1, kind: input, shape index: {}]   ;;  %s462_s2 = inlined_call_operand.vmem [shape: f32[1,32], index: 2, kind: input, shape index: {}]   ;;  %s463_s3 = inlined_call_operand.vmem [shape: f32[1,32], index: 3, kind: input, shape index: {}]   ;;  %s464_s4 = inlined_call_operand.<no memory space> [shape: f32[1,1], index: 4, kind: input, shape index: {}]   ;;  %s465_s5 = inlined_call_operand.hbm [shape: f32[1,1,16], index: 5, kind: output, shape index: {}]  }
   0x1   :  { %v23_v0 = vld [vmem:[%s460_s0] sm:$0xff]  ;;  %337 = vset.pattern.permute.xlu1 %v375_v1  ;;  %336 = vset.pattern.permute.xlu0 %v376_v2  ;;  %v24_v4 = vld [vmem:[%s460_s0 + $0x8] sm:$0xff] }
   0x2   :  { %v340_v3 = vld [vmem:[%s461_s1] sm:$0xff]   ;;  %36 = vperm.xlu1 %337, %v23_v0   ;;  %28 = vperm.xlu0 %336, %v23_v0   ;;  %v341_v6 = vld [vmem:[%s461_s1 + $0x8] sm:$0xff]  }
   0x3   :  { %300 = vmatprep.subr.bf16.mxu0 %v377_v5 }
   0x4   :  { %301 = vmatpush3.bf16.msra.mxu0 %v340_v3 }
   0x5   :  { %302 = vmatprep.subr.bf16.mxu0 %v377_v5 }
   0x6   :  { %39 = vperm.xlu1 %337, %v24_v4   ;;  %31 = vperm.xlu0 %336, %v24_v4  }
   0x7   :  { %11 = vsyncpa [#allocation4], 0  ;;  %v342_v7 = vld [vmem:[%s461_s1 + $0x10] sm:$0xff]   ;;  %v378_v8 = vmov 2   ;;  %v343_v9 = vld [vmem:[%s461_s1 + $0x18] sm:$0xff]   ;;  %vm379_vm0 = vmmov 0   ;;  %v25_v14 = vlaneseq  ;;  %v173_v37 = vstv %s464_s4 }
   0x8   :  { %303 = vmatpush3.bf16.msra.mxu0 %v341_v6  ;;  %v344_v10 = vld [vmem:[%s461_s1 + $0x20] sm:$0xff]   ;;  %314 = vmatprep.mubr.msk.bf16.mxu0 %vm379_vm0, %v377_v5  ;;  %v345_v11 = vld [vmem:[%s461_s1 + $0x28] sm:$0xff]   ;;  %v346_v12 = vld [vmem:[%s461_s1 + $0x30] sm:$0x7f]   ;;  %vm124_vm1 = vcmask 1046528   ;;  %vm120_vm12 = vcmask 900096  }
   0x9   :  { %304 = vmatprep.subr.bf16.mxu0 %v377_v5  ;;  %322 = vmatprep.mubr.msk.f32.mxu1 %vm379_vm0, %v377_v5  ;;  %v126_v13 = vsel %vm124_vm1, %v346_v12, 0  ;;  %v26_v17 = vand.u32 127, %v25_v14  ;;  %v380_v25 = vmov 0.0|0.0   ;;  %v276_v26 = vld [vmem:[%s462_s2] ss:$0 sm:$0xff]  ;;  %vm174_vm13 = vcmask 261120  }
   0xa   :  { %339 = vset.pattern.permute.xlu1 %v378_v8  ;;  %338 = vset.pattern.permute.xlu0 %v378_v8  ;;  %vm327_vm14 = vmpackc.low %vm174_vm13, %vm174_vm13  ;;  %v171_v36 = vld [vmem:[%s463_s3] sm:$0x1]  ;;  %s381_s2 = smov [#allocation3]   ;;  %vm260_vm15 = vcmask 122880  }
   0xb   :  { %49 = vperm.xlu1 %339, %v24_v4   ;;  %46 = vperm.xlu0 %338, %v23_v0   ;;  %s268_s15 = sshll.u32 %s381_s2, 4  ;;  %s269_s15 = int_to_ptr.vmem [resolvable:$true] %s268_s15 }
   0xc   :  { %305 = vmatpush3.bf16.msra.mxu0 %v342_v7  ;;  %325 = vmatprep.subr.bf16.mxu1 %v380_v25  ;;  %s351_s3 = scalar_lea.vmem %s269_s15, 16  ;;  %s355_s16 = scalar_lea.vmem %s269_s15, 32 }
   0xd   :  { %306 = vmatprep.subr.bf16.mxu0 %v377_v5  ;;  %p352_p0 = scmp.ne.s32.totalorder %s269_s15, %s351_s3  ;;  %p356_p1 = scmp.lt.s32.totalorder %s269_s15, %s269_s15 }
   0xe   :  { %p357_p2 = scmp.lt.s32.totalorder %s355_s16, %s351_s3 }
  0x10   :  { %307 = vmatpush3.bf16.msra.mxu0 %v343_v9  ;;  %p358_p3 = por %p357_p2, %p356_p1 }
  0x11   :  { %308 = vmatprep.subr.bf16.mxu0 %v377_v5 }
  0x12   :  { %p359_p4 = pnand %p358_p3, %p352_p0 }
  0x14   :  { %309 = vmatpush3.bf16.msra.mxu0 %v344_v10 }
  0x15   :  { %310 = vmatprep.subr.bf16.mxu0 %v377_v5 }
  0x18   :  { %311 = vmatpush3.bf16.msra.mxu0 %v345_v11 }
  0x19   :  { %312 = vmatprep.subr.bf16.mxu0 %v377_v5 }
  0x1c   :  { %313 = vmatpush3.bf16.msra.mxu0 %v126_v13 }
  0x81   :  { %v37_v15 = vpop.permute.xlu1 %36  ;;  %v29_v16 = vpop.permute.xlu0 %28 }
  0x82   :  { %vm41_vm2 = vcmp.eq.s32.totalorder %v26_v17, %v37_v15  ;;  %vm33_vm3 = vcmp.eq.s32.totalorder %v26_v17, %v29_v16 }
  0x83   :  { %vm43_vm6 = vmor %vm33_vm3, %vm41_vm2 }
  0x85   :  { %v40_v18 = vpop.permute.xlu1 %39  ;;  %v32_v19 = vpop.permute.xlu0 %31 }
  0x86   :  { %vm42_vm4 = vcmp.eq.s32.totalorder %v26_v17, %v40_v18  ;;  %vm34_vm5 = vcmp.eq.s32.totalorder %v26_v17, %v32_v19 }
  0x87   :  { %vm44_vm7 = vmor %vm34_vm5, %vm42_vm4 }
  0x8a   :  { %v50_v20 = vpop.permute.xlu1 %49  ;;  %v47_v21 = vpop.permute.xlu0 %46 }
  0x8b   :  { %vm52_vm8 = vcmp.eq.s32.totalorder %v26_v17, %v50_v20  ;;  %vm51_vm9 = vcmp.eq.s32.totalorder %v26_v17, %v47_v21 }
  0x8c   :  { %vm54_vm10 = vmor %vm44_vm7, %vm52_vm8 }
  0x8d   :  { %v56_v22 = vsel %vm54_vm10, 1.0, %v377_v5  ;;  %vm53_vm11 = vmor %vm43_vm6, %vm51_vm9 }
  0x8e   :  { %v55_v23 = vsel %vm53_vm11, 1.0, %v377_v5 }
  0x8f   :  { %v57_v24 = vpack.c.bf16 %v56_v22, %v55_v23 }
  0x91   :  { %315 = vmatmul.mubr.msk.bf16.vlgmr.msra.gmra.mrb[0].mxu0 %vm120_vm12, %v57_v24 }
 0x164   :  { %v162_v27 = vpop.f32.mrb[0].mxu0 }
 0x165   :  { %v163_v28 = vadd.f32 %v276_v26, %v162_v27  ;;  %v316_v29 = vpop.f32.mrb[1].mxu0 }
 0x166   :  { %v165_v30 = vpop.f32.mrb[2].mxu0 }
 0x167   :  { %v166_v31 = vadd.f32 %v276_v26, %v165_v30  ;;  %v317_v32 = vpop.f32.mrb[3].mxu0  ;;  %v169_v33 = vmax.f32 %v163_v28, 0.0 }
 0x169   :  { %v170_v34 = vmax.f32 %v166_v31, 0.0 }
 0x16b   :  { %v326_v35 = vpack.c.bf16 %v170_v34, %v169_v33 }
 0x16d   :  { %328 = vmatpush3.bf16.xpose.msk.msra.mxu1 %vm327_vm14, %v326_v35 }
 0x174   :  { %323 = vmatmul.mubr.msk.f32.vlgmr.msra.gmra.mrb[0].mxu1 %vm174_vm13, %v171_v36 }
 0x247   :  { %v250_v38 = vpop.f32.mrb[0].mxu1 }
 0x248   :  { %v251_v39 = vadd.f32 %v250_v38, %v173_v37  ;;  %v324_v40 = vpop.f32.mrb[1].mxu1 }
 0x24a   :  { %v288_v41 = vmul.f32 -1.442695, %v251_v39 }
 0x24c   :  { %347 = vpow2.f32 %v288_v41 }
 0x256   :  { %v348_v42 = vpop.eup %347 }
 0x257   :  { %v257_v43 = vadd.f32 1.0, %v348_v42 }
 0x259   :  { %349 = vrcp.f32 %v257_v43 }
 0x263   :  { %v350_v44 = vpop.eup %349 }
 0x264   :  { %261 = vst.msk [vmem:[#allocation3] sm:$0x1] %vm260_vm15, %v350_v44 }
 0x265   :  { %362 = shalt.err (!%p359_p4)
}
 0x266   :  { %s363_s18 = scalar_lea.hbm %s465_s5, 16 }
 0x267   :  { %p364_p5 = scmp.ne.s32.totalorder %s465_s5, %s363_s18  ;;  %p367_p6 = scmp.lt.u32.totalorder %s363_s18, %s465_s5 }
 0x269   :  { %p369_p7 = pnand %p367_p6, %p364_p5 }
 0x26b   :  { %372 = shalt.err (!%p369_p7)
}
 0x26c   :  { %271 = dma.vmem_to_hbm [thread:$0]  %s269_s15, 16, %s465_s5, [#allocation4]  }
 0x26d   :  { %373 = dma.done.wait [#allocation4], 16  }
 0x26e   :  { %374 = vsyncadd [#allocation4], 4294967280 }
 0x26f   :  { %275 = vsyncpa [#allocation4], 1 }

</bundles_post_ra>
